<compile_context>
chip_gen: v5e
topology: v5e:2x2
jax: 0.10.0
libtpu: 0.0.40
codegen_flags: <defaults>
</compile_context>

<pallas_src>
import jax
import jax.numpy as jnp
from jax import lax
from jax.experimental import pallas as pl
from jax.experimental.pallas import tpu as pltpu

_LANES = 128


def _vmem_capacity_bytes():
    """Physical VMEM per TensorCore; fall back to the smallest generation (v7x)."""
    try:
        return int(pltpu.get_tpu_info().vmem_capacity_bytes)
    except Exception:
        return 64 << 20


def _pick_spatial_split(S, B):
    """Split the flattened spatial axis only to create extra parallel grid work
    (v7x has 2 TensorCores) when the batch axis alone is insufficient.  Chunks
    must keep the sublane dim a multiple of 8 (or the whole axis)."""
    if B >= 2 or S < 16:
        return 1
    for n_s in (2, 4):
        if S % n_s == 0 and (S // n_s) % 8 == 0:
            return n_s
    return 1


def spatial_attention(x, w, b, *, c_tile=None):
    """SpatialAttention forward: sigmoid(conv7x7([max_c(x); mean_c(x)])).

    x: (B, C, H, W) NCHW input.
    w: (1, 2, K, K) OIHW conv weight; input chan 0 sees the channel-max map,
       input chan 1 the channel-mean map (matches torch.cat([max, avg], 1)).
    b: (1,) conv bias.
    Returns (B, 1, H, W).
    """
    B, C, H, W = x.shape
    Cout, Cin, K, K2 = w.shape
    assert (Cout, Cin) == (1, 2) and K == K2, ("unexpected conv weight shape", w.shape)
    P = K // 2

    # ---- lane-dense flattened spatial layout --------------------------------
    HW = H * W
    S = pl.cdiv(HW, _LANES)
    HW_pad = S * _LANES
    x_flat = x.reshape(B, C, HW)
    if HW_pad != HW:
        # Zero-pad H*W up to a lane multiple (extra copy only in this case; the
        # padded lanes are discarded after the kernel so their values are irrelevant).
        x_flat = jnp.pad(x_flat, ((0, 0), (0, 0), (0, HW_pad - HW)))
    x_flat = x_flat.reshape(B, C, S, _LANES)
    itemsize = x.dtype.itemsize

    # ---- tiling --------------------------------------------------------------
    n_s = _pick_spatial_split(S, B)
    s_tile = S // n_s

    vmem_cap = _vmem_capacity_bytes()
    # The double-buffered x block dominates VMEM; leave headroom for the tiny
    # output block, the fp32 accumulators and compiler scratch.
    block_budget = min(16 << 20, vmem_cap // 5)
    per_channel = s_tile * _LANES * itemsize
    if c_tile is None:
        c_tile = block_budget // per_channel
    c_tile = max(1, int(min(c_tile, C)))
    n_c = pl.cdiv(C, c_tile)
    c_rem = C - (n_c - 1) * c_tile          # valid channels in the last (maybe partial) tile
    block_bytes = c_tile * per_channel

    inv_c = 1.0 / C                         # mean divides by the TRUE channel count

    def kernel(x_ref, out_ref, max_acc, sum_acc):
        ci = pl.program_id(2)
        n_steps = pl.num_programs(2)

        @pl.when(ci == 0)
        def _init():
            max_acc[...] = jnp.full_like(max_acc, -jnp.inf)
            sum_acc[...] = jnp.zeros_like(sum_acc)

        def accumulate(n_valid):
            xb = x_ref[0]                   # (c_tile, s_tile, 128), native dtype
            if n_valid != c_tile:           # static slice: drop out-of-range channels
                xb = xb[:n_valid]
            # max folded in the native dtype (exact), sum accumulated in fp32;
            # reduction axis is leading/untiled -> pure VPU elementwise fold.
            max_acc[...] = jnp.maximum(max_acc[...],
                                       jnp.max(xb, axis=0).astype(jnp.float32))
            sum_acc[...] = sum_acc[...] + jnp.sum(xb, axis=0, dtype=jnp.float32)

        if c_rem == c_tile:                 # every tile is full: single uniform path
            accumulate(c_tile)
        else:
            @pl.when(ci < n_steps - 1)
            def _full():
                accumulate(c_tile)

            @pl.when(ci == n_steps - 1)
            def _partial():
                accumulate(c_rem)

        @pl.when(ci == n_steps - 1)
        def _finalize():                    # lane-dense, unmasked stores
            out_ref[0, 0] = max_acc[...].astype(out_ref.dtype)
            out_ref[0, 1] = (sum_acc[...] * inv_c).astype(out_ref.dtype)

    cost = pl.CostEstimate(
        flops=2 * B * C * HW,
        transcendentals=0,
        bytes_accessed=int(x_flat.size * itemsize + B * 2 * HW_pad * itemsize),
    )

    vmem_limit = int(min(vmem_cap - (4 << 20),
                         max(32 << 20, 2 * block_bytes + (8 << 20))))

    maps = pl.pallas_call(
        kernel,
        out_shape=jax.ShapeDtypeStruct((B, 2, S, _LANES), x.dtype),
        grid=(B, n_s, n_c),
        in_specs=[
            pl.BlockSpec((1, c_tile, s_tile, _LANES),
                         lambda bi, si, ci: (bi, ci, si, 0)),
        ],
        out_specs=pl.BlockSpec((1, 2, s_tile, _LANES),
                               lambda bi, si, ci: (bi, 0, si, 0)),
        scratch_shapes=[
            pltpu.VMEM((s_tile, _LANES), jnp.float32),   # running channel max
            pltpu.VMEM((s_tile, _LANES), jnp.float32),   # running channel sum
        ],
        compiler_params=pltpu.CompilerParams(
            dimension_semantics=("parallel", "parallel", "arbitrary"),
            vmem_limit_bytes=vmem_limit,
        ),
        cost_estimate=cost,
    )(x_flat)

    # ---- tiny epilogue: 7x7 "same" conv + bias + sigmoid (XLA) ---------------
    # Per perf-review option (a): this touches only 2*H*W values per image
    # (negligible vs. the x reduction) and keeping it out of the kernel removes
    # all lane-unaligned slice/rotate work from the finalize step.
    maps = maps.reshape(B, 2, HW_pad)[:, :, :HW].reshape(B, 2, H, W)
    conv = lax.conv_general_dilated(
        maps.astype(jnp.float32), w.astype(jnp.float32),
        window_strides=(1, 1), padding=((P, P), (P, P)),
        dimension_numbers=("NCHW", "OIHW", "NCHW"))
    out = jax.nn.sigmoid(conv + b.reshape(1, -1, 1, 1).astype(jnp.float32))
    return out.astype(x.dtype)


def reference(x, w, b):
    """Pure-JAX reference mirroring the PyTorch forward."""
    max_map = jnp.max(x, axis=1, keepdims=True)
    avg_map = jnp.mean(x, axis=1, keepdims=True)
    r = jnp.concatenate([max_map, avg_map], axis=1)          # (B, 2, H, W)
    P = w.shape[-1] // 2
    out = lax.conv_general_dilated(
        r, w, window_strides=(1, 1), padding=((P, P), (P, P)),
        dimension_numbers=("NCHW", "OIHW", "NCHW"))
    return jax.nn.sigmoid(out + b.reshape(1, -1, 1, 1))


if __name__ == "__main__":
    B, C, H, W = 2, 8, 16, 16
    K = 7

    key = jax.random.PRNGKey(0)
    kx, kw, kb = jax.random.split(key, 3)
    x = jax.random.normal(kx, (B, C, H, W), dtype=jnp.float32)
    w = 0.1 * jax.random.normal(kw, (1, 2, K, K), dtype=jnp.float32)
    b = 0.1 * jax.random.normal(kb, (1,), dtype=jnp.float32)

    # c_tile=3 does not divide C=8 -> exercises the cdiv grid plus the statically
    # sliced partial last channel tile (grid = (2, 1, 3)) and the init/accumulate/
    # finalize pipeline path.
    out = jax.block_until_ready(spatial_attention(x, w, b, c_tile=3))
    ref = reference(x, w, b)
    assert out.shape == (B, 1, H, W), out.shape
    err1 = float(jnp.max(jnp.abs(out - ref)))
    assert jnp.allclose(out, ref, atol=2e-5, rtol=2e-5), err1

    # Auto tiling plus a spatial size that is NOT a multiple of 128, exercising
    # the lane-padding path (H*W = 120 -> padded to 128, padded lanes discarded).
    x2 = jax.random.normal(kx, (1, 5, 10, 12), dtype=jnp.float32)
    out2 = jax.block_until_ready(spatial_attention(x2, w, b))
    ref2 = reference(x2, w, b)
    assert out2.shape == (1, 1, 10, 12), out2.shape
    err2 = float(jnp.max(jnp.abs(out2 - ref2)))
    assert jnp.allclose(out2, ref2, atol=2e-5, rtol=2e-5), err2

    print("KERNEL_OK")
</pallas_src>

<mosaic_0001>
module attributes {stable_mosaic.version = 11 : i64} {
  func.func @kernel(%arg0: i32, %arg1: i32, %arg2: i32, %arg3: memref<1x3x2x128xf32, #tpu.memory_space<vmem>>, %arg4: memref<1x2x2x128xf32, #tpu.memory_space<vmem>>, %arg5: memref<2x128xf32, #tpu.memory_space<vmem>>, %arg6: memref<2x128xf32, #tpu.memory_space<vmem>>) attributes {dimension_semantics = [#tpu.dimension_semantics<parallel>, #tpu.dimension_semantics<parallel>, #tpu.dimension_semantics<arbitrary>], iteration_bounds = array<i64: 2, 1, 3>, scalar_prefetch = 0 : i64, scratch_operands = 2 : i64, tpu.core_type = #tpu.core_type<tc>, window_params = [{transform_indices = @transform_0, window_bounds = array<i64: 1, 3, 2, 128>}, {transform_indices = @transform_1, window_bounds = array<i64: 1, 2, 2, 128>}]} {
    %c0_i32 = arith.constant 0 : i32
    %0 = arith.cmpi eq, %arg2, %c0_i32 : i32
    %1 = arith.extui %0 : i1 to i32
    %c0_i32_0 = arith.constant 0 : i32
    %2 = arith.cmpi ne, %1, %c0_i32_0 : i32
    scf.if %2 {
      %cst = arith.constant 0xFF800000 : f32
      %12 = vector.broadcast %cst : f32 to vector<2x128xf32>
      %c0 = arith.constant 0 : index
      %c0_6 = arith.constant 0 : index
      %13 = vector.load %arg5[%c0, %c0_6] : memref<2x128xf32, #tpu.memory_space<vmem>>, vector<2x128xf32>
      tpu.vector_store %arg5[%c0, %c0_6], %12 {strides = array<i32>} : memref<2x128xf32, #tpu.memory_space<vmem>>, vector<2x128xf32>,
      %cst_7 = arith.constant 0.000000e+00 : f32
      %14 = vector.broadcast %cst_7 : f32 to vector<2x128xf32>
      %c0_8 = arith.constant 0 : index
      %c0_9 = arith.constant 0 : index
      %15 = vector.load %arg6[%c0_8, %c0_9] : memref<2x128xf32, #tpu.memory_space<vmem>>, vector<2x128xf32>
      tpu.vector_store %arg6[%c0_8, %c0_9], %14 {strides = array<i32>} : memref<2x128xf32, #tpu.memory_space<vmem>>, vector<2x128xf32>,
    } else {
    }
    %c2_i32 = arith.constant 2 : i32
    %3 = arith.cmpi slt, %arg2, %c2_i32 : i32
    %4 = arith.extui %3 : i1 to i32
    %c0_i32_1 = arith.constant 0 : i32
    %5 = arith.cmpi ne, %4, %c0_i32_1 : i32
    scf.if %5 {
      %c0 = arith.constant 0 : index
      %c0_6 = arith.constant 0 : index
      %c0_7 = arith.constant 0 : index
      %c0_8 = arith.constant 0 : index
      %12 = vector.load %arg3[%c0, %c0_6, %c0_7, %c0_8] : memref<1x3x2x128xf32, #tpu.memory_space<vmem>>, vector<1x3x2x128xf32>
      %13 = vector.shape_cast %12 : vector<1x3x2x128xf32> to vector<3x2x128xf32>
      %c0_9 = arith.constant 0 : index
      %c0_10 = arith.constant 0 : index
      %14 = vector.load %arg5[%c0_9, %c0_10] : memref<2x128xf32, #tpu.memory_space<vmem>>, vector<2x128xf32>
      %cst = arith.constant dense<0xFF800000> : vector<2x128xf32>
      %15 = vector.multi_reduction <maximumf>, %13, %cst [0] : vector<3x2x128xf32> to vector<2x128xf32>
      %16 = arith.maximumf %14, %15 : vector<2x128xf32>
      %c0_11 = arith.constant 0 : index
      %c0_12 = arith.constant 0 : index
      %17 = vector.load %arg5[%c0_11, %c0_12] : memref<2x128xf32, #tpu.memory_space<vmem>>, vector<2x128xf32>
      tpu.vector_store %arg5[%c0_11, %c0_12], %16 {strides = array<i32>} : memref<2x128xf32, #tpu.memory_space<vmem>>, vector<2x128xf32>,
      %c0_13 = arith.constant 0 : index
      %c0_14 = arith.constant 0 : index
      %18 = vector.load %arg6[%c0_13, %c0_14] : memref<2x128xf32, #tpu.memory_space<vmem>>, vector<2x128xf32>
      %cst_15 = arith.constant dense<0.000000e+00> : vector<2x128xf32>
      %19 = vector.multi_reduction <add>, %13, %cst_15 [0] : vector<3x2x128xf32> to vector<2x128xf32>
      %20 = arith.addf %18, %19 : vector<2x128xf32>
      %c0_16 = arith.constant 0 : index
      %c0_17 = arith.constant 0 : index
      %21 = vector.load %arg6[%c0_16, %c0_17] : memref<2x128xf32, #tpu.memory_space<vmem>>, vector<2x128xf32>
      tpu.vector_store %arg6[%c0_16, %c0_17], %20 {strides = array<i32>} : memref<2x128xf32, #tpu.memory_space<vmem>>, vector<2x128xf32>,
    } else {
    }
    %c2_i32_2 = arith.constant 2 : i32
    %6 = arith.cmpi eq, %arg2, %c2_i32_2 : i32
    %7 = arith.extui %6 : i1 to i32
    %c0_i32_3 = arith.constant 0 : i32
    %8 = arith.cmpi ne, %7, %c0_i32_3 : i32
    scf.if %8 {
      %c0 = arith.constant 0 : index
      %c0_6 = arith.constant 0 : index
      %c0_7 = arith.constant 0 : index
      %c0_8 = arith.constant 0 : index
      %12 = vector.load %arg3[%c0, %c0_6, %c0_7, %c0_8] : memref<1x3x2x128xf32, #tpu.memory_space<vmem>>, vector<1x3x2x128xf32>
      %13 = vector.shape_cast %12 : vector<1x3x2x128xf32> to vector<3x2x128xf32>
      %14 = vector.extract_strided_slice %13 {offsets = [0, 0, 0], sizes = [2, 2, 128], strides = [1, 1, 1]} : vector<3x2x128xf32> to vector<2x2x128xf32>
      %c0_9 = arith.constant 0 : index
      %c0_10 = arith.constant 0 : index
      %15 = vector.load %arg5[%c0_9, %c0_10] : memref<2x128xf32, #tpu.memory_space<vmem>>, vector<2x128xf32>
      %cst = arith.constant dense<0xFF800000> : vector<2x128xf32>
      %16 = vector.multi_reduction <maximumf>, %14, %cst [0] : vector<2x2x128xf32> to vector<2x128xf32>
      %17 = arith.maximumf %15, %16 : vector<2x128xf32>
      %c0_11 = arith.constant 0 : index
      %c0_12 = arith.constant 0 : index
      %18 = vector.load %arg5[%c0_11, %c0_12] : memref<2x128xf32, #tpu.memory_space<vmem>>, vector<2x128xf32>
      tpu.vector_store %arg5[%c0_11, %c0_12], %17 {strides = array<i32>} : memref<2x128xf32, #tpu.memory_space<vmem>>, vector<2x128xf32>,
      %c0_13 = arith.constant 0 : index
      %c0_14 = arith.constant 0 : index
      %19 = vector.load %arg6[%c0_13, %c0_14] : memref<2x128xf32, #tpu.memory_space<vmem>>, vector<2x128xf32>
      %cst_15 = arith.constant dense<0.000000e+00> : vector<2x128xf32>
      %20 = vector.multi_reduction <add>, %14, %cst_15 [0] : vector<2x2x128xf32> to vector<2x128xf32>
      %21 = arith.addf %19, %20 : vector<2x128xf32>
      %c0_16 = arith.constant 0 : index
      %c0_17 = arith.constant 0 : index
      %22 = vector.load %arg6[%c0_16, %c0_17] : memref<2x128xf32, #tpu.memory_space<vmem>>, vector<2x128xf32>
      tpu.vector_store %arg6[%c0_16, %c0_17], %21 {strides = array<i32>} : memref<2x128xf32, #tpu.memory_space<vmem>>, vector<2x128xf32>,
    } else {
    }
    %c2_i32_4 = arith.constant 2 : i32
    %9 = arith.cmpi eq, %arg2, %c2_i32_4 : i32
    %10 = arith.extui %9 : i1 to i32
    %c0_i32_5 = arith.constant 0 : i32
    %11 = arith.cmpi ne, %10, %c0_i32_5 : i32
    scf.if %11 {
      %c0 = arith.constant 0 : index
      %c0_6 = arith.constant 0 : index
      %12 = vector.load %arg5[%c0, %c0_6] : memref<2x128xf32, #tpu.memory_space<vmem>>, vector<2x128xf32>
      %c0_7 = arith.constant 0 : index
      %c0_8 = arith.constant 0 : index
      %c0_9 = arith.constant 0 : index
      %c0_10 = arith.constant 0 : index
      %13 = vector.load %arg4[%c0_7, %c0_8, %c0_9, %c0_10] : memref<1x2x2x128xf32, #tpu.memory_space<vmem>>, vector<1x1x2x128xf32>
      %14 = vector.shape_cast %13 : vector<1x1x2x128xf32> to vector<2x128xf32>
      %15 = vector.shape_cast %12 : vector<2x128xf32> to vector<1x1x2x128xf32>
      tpu.vector_store %arg4[%c0_7, %c0_8, %c0_9, %c0_10], %15 {strides = array<i32>} : memref<1x2x2x128xf32, #tpu.memory_space<vmem>>, vector<1x1x2x128xf32>,
      %c0_11 = arith.constant 0 : index
      %c0_12 = arith.constant 0 : index
      %16 = vector.load %arg6[%c0_11, %c0_12] : memref<2x128xf32, #tpu.memory_space<vmem>>, vector<2x128xf32>
      %cst = arith.constant 1.250000e-01 : f32
      %17 = vector.broadcast %cst : f32 to vector<2x128xf32>
      %18 = arith.mulf %16, %17 : vector<2x128xf32>
      %c0_13 = arith.constant 0 : index
      %c1 = arith.constant 1 : index
      %c0_14 = arith.constant 0 : index
      %c0_15 = arith.constant 0 : index
      %19 = vector.load %arg4[%c0_13, %c1, %c0_14, %c0_15] : memref<1x2x2x128xf32, #tpu.memory_space<vmem>>, vector<1x1x2x128xf32>
      %20 = vector.shape_cast %19 : vector<1x1x2x128xf32> to vector<2x128xf32>
      %21 = vector.shape_cast %18 : vector<2x128xf32> to vector<1x1x2x128xf32>
      tpu.vector_store %arg4[%c0_13, %c1, %c0_14, %c0_15], %21 {strides = array<i32>} : memref<1x2x2x128xf32, #tpu.memory_space<vmem>>, vector<1x1x2x128xf32>,
    } else {
    }
    return
  }
  func.func @transform_0(%arg0: i32, %arg1: i32, %arg2: i32) -> (i32, i32, i32, i32) {
    %c0_i32 = arith.constant 0 : i32
    %c0_i32_0 = arith.constant 0 : i32
    return %arg0, %arg2, %arg1, %c0_i32 : i32, i32, i32, i32
  }
  func.func @transform_1(%arg0: i32, %arg1: i32, %arg2: i32) -> (i32, i32, i32, i32) {
    %c0_i32 = arith.constant 0 : i32
    %c0_i32_0 = arith.constant 0 : i32
    %c0_i32_1 = arith.constant 0 : i32
    return %arg0, %c0_i32, %arg1, %c0_i32_0 : i32, i32, i32, i32
  }
}

</mosaic_0001>

<bundles_post_ra>
// kernel: tpu_custom_call.1
= control target key start
LH: loop header
LB: loop body
LE: loop exit
PB: predicated region body
PF: predicated region fallthrough
CT: control target
= control target key end

     0   :  { %6 = vsyncpa [#allocation5], 0  ;;  %s869_s0 = inlined_call_operand.hbm [shape: f32[2,8,2,128], index: 0, kind: input, shape index: {}]   ;;  %s870_s1 = inlined_call_operand.hbm [shape: f32[2,2,2,128], index: 1, kind: output, shape index: {}]  }
   0x1   :  { %8 = vsyncpa [#allocation5 + $0x1], 0 }
   0x2   :  { %9 = vsyncpa [#allocation6], 0 }
   0x3   :  { %11 = vsyncpa [#allocation6 + $0x1], 0  ;;  %s648_s6 = smov 0   ;;  %s650_s7 = smov 0  }
   0x4   :  { %s652_s8 = smov 0   ;;  %s654_s9 = smov 0  }
   0x5   :  { %s656_s10 = smov 0   ;;  %s658_s11 = smov 0  }
   0x6   :  { %s660_s12 = smov 0   ;;  %s662_s13 = smov 0  }
   0x7   :  { %s664_s14 = smov 0   ;;  %s666_s15 = smov 0  }
   0x8   :  { %s668_s16 = smov 0  }
   0x9 LB: > { %875 = sst [smem:[#allocation10_spill]] %s621_s14  ;;  %s342_s17 = sadd.s32 4294967295, %s629_s16   ;;  %s629_s16 = sphi %s668_s16, %s17_s16   ;;  %s625_s15 = sphi %s666_s15, %s889_s15   ;;  %s621_s14 = sphi %s664_s14, %s888_s14   ;;  %s617_s13 = sphi %s662_s13, %s887_s13   ;;  %s613_s12 = sphi %s660_s12, %s886_s12   ;;  %s609_s11 = sphi %s658_s11, %s895_s11   ;;  %s605_s10 = sphi %s656_s10, %s894_s10   ;;  %s601_s9 = sphi %s654_s9, %s893_s9   ;;  %s597_s8 = sphi %s652_s8, %s892_s8   ;;  %s593_s7 = sphi %s650_s7, %s891_s7   ;;  %s589_s6 = sphi %s648_s6, %s890_s6  }
   0xa   : > { %876 = sst [smem:[#allocation11_spill]] %s625_s15  ;;  %s343_s18 = sadd.s32 4294967294, %s629_s16  }
   0xb   : > { %s29_s19 = sadd.s32 1, %s621_s14  ;;  %s36_s20 = sadd.s32 1, %s625_s15 }
   0xc   : > { %p30_p0 = scmp.ge.s32.totalorder %s29_s19, 3  ;;  %s47_s21 = sadd.s32 1, %s609_s11 }
   0xd   : > { %p54_p1 = scmp.ne.s32.totalorder %s609_s11, %s605_s10  ;;  %p55_p2 = scmp.eq.s32.totalorder %s629_s16, 0 }
   0xe   : > { %s897_s19 = smov (%p30_p0, %s29_s19), 0  ;;  %s899_s20 = smov (!%p30_p0, %s36_s20), %s625_s15 }
   0xf   : > { %877 = sst [smem:[#allocation12_spill]] %s897_s19  ;;  %s41_s22 = ssub.s32 %s621_s14, %s897_s19 }
  0x10   : > { %p714_p3 = por %p55_p2, %p54_p1  ;;  %p38_p4 = scmp.ge.s32.totalorder %s899_s20, 2 }
  0x11   : > { %p60_p5 = scmp.ne.s32.totalorder %s605_s10, %s601_s9  ;;  %p61_p6 = scmp.eq.s32.totalorder %s342_s17, 0 }
  0x12   : > { %s75_s24 = sadd.s32 1, %s597_s8  ;;  %s901_s20 = smov (%p38_p4, %s899_s20), 0 }
  0x13   : > { %879 = sst [smem:[#allocation13_spill]] %s901_s20  ;;  %p722_p7 = por %p61_p6, %p60_p5 }
  0x14   : > { %p85_p8 = scmp.ne.s32.totalorder %s597_s8, %s593_s7  ;;  %s40_s26 = ssub.s32 %s625_s15, %s901_s20 }
  0x15   : > { %p86_p9 = scmp.eq.s32.totalorder %s342_s17, 5  ;;  %s42_s27 = sor.u32 %s41_s22, %s40_s26 }
  0x16   : > { %p73_p10 = scmp.eq.s32.totalorder %s40_s26, 0  ;;  %p45_p11 = scmp.eq.s32.totalorder %s42_s27, 0 }
  0x17   : > { %p730_p12 = por %p86_p9, %p85_p8  ;;  %p91_p13 = scmp.ne.s32.totalorder %s593_s7, %s589_s6 }
  0x18   : > { %s735_s29 = scalar_select %p73_p10, %s597_s8, %s75_s24  }
  0x19   : > { %s738_s30 = scalar_select %p45_p11, %s609_s11, %s47_s21  }
  0x1a   : > { %p92_p0 = scmp.eq.s32.totalorder %s343_s18, 5  ;;  %p345_p2 = scmp.ge.s32.totalorder %s629_s16, 6 }
  0x1b   : > { %882 = sst [smem:[#allocation14_spill]] %s738_s30 }
  0x1c   : > { %p742_p1 = por %p92_p0, %p91_p13  ;;  %108 = sbr.rel (%p345_p2) target bundleno = 72 (0x48), region = 16 }
  0x21   : > { %111 = sbr.rel (!%p714_p3) target bundleno = 72 (0x48), region = 20  ;;  %s112_s3 = sand.u32 (%p714_p3), 1, %s609_s11  }
  0x22   : > { %s117_s4 = smul.u32 (%p714_p3), 3, %s621_s14  ;;  %s754_s22 = scalar_lea.sflag (%p714_p3), [#allocation5], %s112_s3 }
  0x23   : > { %s364_s5 = smul.u32 (%p714_p3), 6, %s112_s3 }
  0x24   : > { %s118_s9 = ssub.s32 (%p714_p3), 8, %s117_s4 }
  0x25   : > { %p119_p4 = scmp.lt.s32.totalorder (%p714_p3), %s118_s9, 3  ;;  %s116_s24 = scalar_lea.vmem (%p714_p3), [#allocation4], %s364_s5 }
  0x27   : > { %s903_s9 = smov (!%p119_p4, %s118_s9), 3 }
  0x28   : > { %s346_s17 = sshll.u32 %s903_s9, 1 }
  0x29   : > { %s122_s18 = ssub.s32 6, %s346_s17 }
  0x2a   : > { %s123_s21 = sshll.u32 %s122_s18, 4 }
  0x2b   : > { %124 = vsyncadd %s754_s22, %s123_s21  ;;  %p757_p3 = scmp.ne.s32.totalorder %s346_s17, 0  ;;  %s348_s26 = sshll.u32 %s625_s15, 3 }
  0x2c   : > { %s128_s27 = sadd.s32 %s348_s26, %s117_s4  ;;  %s762_s20 = sshll.u32 %s116_s24, 4  ;;  %s135_s20 = int_to_ptr.vmem [resolvable:$true] %s762_s20 }
  0x2d   : > { %s349_s19 = sshll.u32 %s128_s27, 1  ;;  %s351_s21 = sshll.u32 %s903_s9, 5 }
  0x2e   : > { %s130_s5 = scalar_lea.hbm %s869_s0, %s349_s19  ;;  %s470_s30 = sshrl.u32 %s351_s21, 4 }
  0x2f   : > { %s132_s14 = sshll.u32 %s130_s5, 4  ;;  %s479_s26 = scalar_lea.hbm %s869_s0, 32  ;;  %s769_s14 = int_to_ptr.hbm [resolvable:$true] %s132_s14 }
  0x30   : > { %s468_s17 = sshra.s32 %s769_s14, 4  ;;  %s469_s17 = int_to_ptr.hbm [resolvable:$true] %s468_s17 }
  0x31   : > { %s475_s15 = scalar_lea.hbm %s469_s17, %s470_s30 }
  0x32   : > { %p476_p5 = scmp.ne.s32.totalorder %s469_s17, %s475_s15  ;;  %p481_p9 = scmp.lt.s32.totalorder %s479_s26, %s475_s15 }
  0x34   : > { %p477_p6 = pnand %p476_p5, %p757_p3 }
  0x36   : > { %p478_p8 = pneg %p477_p6 }
  0x38   : > { %p483_p10 = pnand %p481_p9, %p478_p8 }
  0x3a   : > { %486 = shalt.err (!%p483_p10)
}
  0x3b   : > { %s487_s19 = sshra.s32 %s135_s20, 4  ;;  %s631_s3 = smov [#allocation4]   ;;  %s488_s19 = int_to_ptr.vmem [resolvable:$true] %s487_s19 }
  0x3c   : > { %s494_s27 = scalar_lea.vmem %s488_s19, %s470_s30  ;;  %s498_s18 = scalar_lea.vmem %s631_s3, 12 }
  0x3d   : > { %p495_p11 = scmp.ne.s32.totalorder %s488_s19, %s494_s27  ;;  %p500_p2 = scmp.lt.s32.totalorder %s498_s18, %s494_s27 }
  0x3f   : > { %p496_p13 = pnand %p495_p11, %p757_p3 }
  0x41   : > { %p497_p0 = pneg %p496_p13 }
  0x43   : > { %p502_p4 = pnand %p500_p2, %p497_p0 }
  0x45   : > { %505 = shalt.err (!%p502_p4)
}
  0x46   : > { %s632_s5 = smov 32   ;;  %s633_s15 = smov 2  }
  0x47   : > { %140 = dma.hbm_to_vmem [thread:$0]  (%p757_p3), %s769_s14, %s351_s21, %s135_s20, %s754_s22, %s632_s5, %s632_s5, %s633_s15  }
  0x48 PF: > { %p352_p5 = scmp.ge.s32.totalorder %s629_s16, 1  ;;  %p142_p6 = scmp.lt.s32.totalorder %s629_s16, 7 }
  0x4a   : > { %p143_p8 = pnand %p352_p5, %p142_p6 }
  0x4b   : > { %s148_s30 = sand.u32 (!%p143_p8), 1, %s605_s10  }
  0x4c   : > { %146 = sbr.rel (%p143_p8) target bundleno = 150 (0x96), region = 24  ;;  %s149_s4 = scalar_lea.sflag (!%p143_p8), [#allocation5], %s148_s30 }
  0x4d   : > { %s365_s17 = smul.u32 (!%p143_p8), 6, %s148_s30 }
  0x4f   : > { %s794_s24 = scalar_lea.vmem (!%p143_p8), [#allocation4], %s365_s17 }
  0x51   : > { %580 = dma.done.wait (%p722_p7), %s149_s4, 96  }
  0x52   : > { %582 = vsyncadd (%p722_p7), %s149_s4, 4294967200  ;;  %s169_s14 = sand.u32 1, %s593_s7   ;;  %p354_p3 = scmp.ne.s32.totalorder %s613_s12, 0 }
  0x53   : > { %s353_s20 = sshll.u32 %s169_s14, 2 }
  0x54   : > { %s803_s9 = scalar_lea.vmem [#allocation7], %s353_s20  ;;  %180 = sbr.rel (%p354_p3) target bundleno = 92 (0x5c), region = 32 }
  0x59   : > { %v634_v0 = vmov -inf   ;;  %v635_v1 = vmov 0.0  }
  0x5a   : > { %181 = vst [vmem:[#allocation2] sm:$0x3] %v634_v0 }
  0x5b   : > { %182 = vst [vmem:[#allocation3] sm:$0x3] %v635_v1 }
  0x5c PF: > { %p355_p9 = scmp.ge.s32.totalorder %s613_s12, 2 }
  0x5e   : > { %186 = sbr.rel (%p355_p9) target bundleno = 110 (0x6e), region = 36 }
  0x63   : > { %v187_v2 = vld [vmem:[%s794_s24] sm:$0x3]  ;;  %v188_v3 = vld [vmem:[%s794_s24 + $0x2] sm:$0x3]  ;;  %v189_v4 = vld [vmem:[%s794_s24 + $0x4] sm:$0x3] }
  0x64   : > { %vm191_vm0 = vcmask 1041408   ;;  %v190_v12 = vld [vmem:[#allocation2] sm:$0x3]  ;;  %v199_v15 = vld [vmem:[#allocation3] sm:$0x3] }
  0x65   : > { %v192_v5 = vsel %vm191_vm0, %v187_v2, -inf  ;;  %v193_v6 = vsel %vm191_vm0, %v188_v3, -inf  ;;  %v194_v7 = vsel %vm191_vm0, %v189_v4, -inf  ;;  %v200_v8 = vsel %vm191_vm0, %v187_v2, 0.0 }
  0x66   : > { %v195_v9 = vmax.f32 %v192_v5, %v193_v6  ;;  %v201_v10 = vsel %vm191_vm0, %v188_v3, 0.0  ;;  %v203_v11 = vsel %vm191_vm0, %v189_v4, 0.0 }
  0x67   : > { %v202_v13 = vadd.f32 %v201_v10, %v200_v8 }
  0x68   : > { %v196_v14 = vmax.f32 %v195_v9, %v194_v7 }
  0x69   : > { %v204_v16 = vadd.f32 %v203_v11, %v202_v13 }
  0x6a   : > { %v197_v17 = vmax.f32 %v190_v12, %v196_v14 }
  0x6b   : > { %v205_v18 = vadd.f32 %v204_v16, %v199_v15 }
  0x6c   : > { %198 = vst [vmem:[#allocation2] sm:$0x3] %v197_v17 }
  0x6d   : > { %206 = vst [vmem:[#allocation3] sm:$0x3] %v205_v18 }
  0x6e PF: > { %p356_p7 = scmp.ne.s32.totalorder %s613_s12, 2 }
  0x70   : > { %210 = sbr.rel (%p356_p7) target bundleno = 134 (0x86), region = 40 }
  0x75   : > { %v211_v19 = vld [vmem:[%s794_s24] sm:$0x3]  ;;  %v212_v20 = vld [vmem:[%s794_s24 + $0x2] sm:$0x3]  ;;  %vm214_vm1 = vcmask 1041408  }
  0x76   : > { %v220_v21 = vld [vmem:[#allocation3] sm:$0x3]  ;;  %v221_v22 = vsel %vm214_vm1, %v211_v19, 0.0  ;;  %v222_v23 = vsel %vm214_vm1, %v212_v20, 0.0  ;;  %v213_v25 = vld [vmem:[#allocation2] sm:$0x3] }
  0x77   : > { %v223_v24 = vadd.f32 %v222_v23, %v221_v22  ;;  %v215_v26 = vsel %vm214_vm1, %v211_v19, -inf  ;;  %v216_v27 = vsel %vm214_vm1, %v212_v20, -inf }
  0x78   : > { %v217_v28 = vmax.f32 %v215_v26, %v216_v27 }
  0x79   : > { %v224_v29 = vadd.f32 %v223_v24, %v220_v21 }
  0x7a   : > { %v218_v30 = vmax.f32 %v213_v25, %v217_v28 }
  0x7b   : > { %225 = vst [vmem:[#allocation3] sm:$0x3] %v224_v29 }
  0x7c   : > { %219 = vst [vmem:[#allocation2] sm:$0x3] %v218_v30 }
  0x82   : > { %v228_v31 = vld [vmem:[#allocation3] sm:$0x3] }
  0x83   : > { %v226_v32 = vld [vmem:[#allocation2] sm:$0x3]  ;;  %v229_v33 = vmul.f32 0.125, %v228_v31 }
  0x84   : > { %227 = vst [vmem:[%s803_s9] sm:$0x3] %v226_v32 }
  0x85   : > { %357 = vst [vmem:[%s803_s9 + $0x2] sm:$0x3] %v229_v33 }
  0x86 PF: > { %s363_s12 = sshll.u32 %s617_s13, 2  ;;  %s246_s21 = sshll.u32 %s803_s9, 4  ;;  %s247_s21 = int_to_ptr.vmem [resolvable:$true] %s246_s21 }
  0x87   : > { %s245_s23 = scalar_lea.hbm %s870_s1, %s363_s12  ;;  %s233_s19 = scalar_lea.sflag [#allocation6], %s169_s14 }
  0x88   : > { %s248_s26 = sshll.u32 %s245_s23, 4  ;;  %s527_s13 = scalar_lea.hbm %s870_s1, 8  ;;  %s249_s26 = int_to_ptr.hbm [resolvable:$true] %s248_s26 }
  0x89   : > { %s521_s27 = sshra.s32 %s249_s26, 4  ;;  %s522_s27 = int_to_ptr.hbm [resolvable:$true] %s521_s27 }
  0x8a   : > { %s523_s3 = scalar_lea.hbm %s522_s27, 4  ;;  %p528_p0 = scmp.lt.s32.totalorder %s522_s27, %s870_s1 }
  0x8b   : > { %p524_p10 = scmp.ne.s32.totalorder %s522_s27, %s523_s3  ;;  %p529_p2 = scmp.lt.s32.totalorder %s527_s13, %s523_s3 }
  0x8d   : > { %p525_p11 = pnand %p524_p10, %p730_p12  ;;  %p530_p4 = por %p529_p2, %p528_p0 }
  0x8f   : > { %p526_p13 = pneg %p525_p11 }
  0x91   : > { %p531_p5 = pnand %p530_p4, %p526_p13 }
  0x93   : > { %534 = shalt.err (!%p531_p5)
}
  0x94   : > { %s636_s17 = smov 32   ;;  %s637_s4 = smov 2  }
  0x95   : > { %367 = dma.vmem_to_hbm [thread:$0]  (%p730_p12), %s247_s21, 64, %s249_s26, %s233_s19, %s636_s17, %s636_s17, %s637_s4  }
  0x96 PF: > { %p373_p6 = scmp.ge.s32.totalorder %s629_s16, 2  ;;  %s263_s24 = sand.u32 1, %s589_s6  }
  0x97   : > { %s264_s14 = scalar_lea.sflag [#allocation6], %s263_s24 }
  0x98   : > { %p370_p8 = pnand %p373_p6, %p742_p1 }
  0x9a   : > { %p371_p3 = pneg %p370_p8 }
  0x9c   : > { %584 = dma.done.wait (%p371_p3), %s264_s14, 64  }
  0x9d   : > { %586 = vsyncadd (%p371_p3), %s264_s14, 4294967232  ;;  %s17_s16 = sadd.s32 1, %s629_s16   ;;  %s885_s28 = sld [smem:[#allocation14_spill]] }
  0x9e   : > { %p14_p9 = scmp.ge.s32.totalorder %s17_s16, 8   ;;  %s886_s12 = sld [smem:[#allocation10_spill]] }
  0x9f   : > { %s887_s13 = sld [smem:[#allocation11_spill]]  ;;  %s890_s6 = smov %s593_s7 }
  0xa0   : > { %s888_s14 = sld [smem:[#allocation12_spill]]  ;;  %s891_s7 = smov %s597_s8 }
  0xa1   : > { %s889_s15 = sld [smem:[#allocation13_spill]]  ;;  %s892_s8 = smov %s735_s29 }
  0xa2   : > { %s893_s9 = smov %s605_s10  ;;  %s894_s10 = smov %s609_s11 }
  0xa3   : > { %s895_s11 = smov %s885_s28  ;;  %16 = sbr.rel (!%p14_p9) target bundleno = 9 (0x9), region = 82 }
  0xa8   :  { %270 = vsyncpa [#allocation5], 1 }
  0xa9   :  { %272 = vsyncpa [#allocation5 + $0x1], 1 }
  0xaa   :  { %273 = vsyncpa [#allocation6], 1 }
  0xab   :  { %275 = vsyncpa [#allocation6 + $0x1], 1 }

</bundles_post_ra>
